<compile_context>
chip_gen: v7x
topology: tpu7x:2x2x1
jax: 0.10.0
libtpu: 0.0.40
codegen_flags: <defaults>
</compile_context>

<pallas_src>
import jax
import jax.numpy as jnp
from jax.experimental import pallas as pl
from jax.experimental.pallas import tpu as pltpu


def _round_up(n, m):
    return ((n + m - 1) // m) * m


def mlp_kernel(x_ref, w1_ref, b1_ref, w2_ref, b2_ref, w3_ref, b3_ref, o_ref):
    # Fused: fc1 -> leaky_relu -> [dropout=id] -> fc2 -> leaky_relu -> [dropout=id] -> fc3
    x = x_ref[...]                                              # (tb, 2)

    # fc1 on the MXU (K=2). MXU utilization is irrelevant: its VLIW slot has
    # slack while VALU is the binding slot, so this is cheaper than two VPU
    # rank-1 broadcast mul-adds.
    h1 = jnp.dot(x, w1_ref[...], preferred_element_type=jnp.float32) + b1_ref[...]
    h1 = jnp.maximum(h1, 0.2 * h1)                              # LeakyReLU(0.2), 2 VALU ops

    h2 = jnp.dot(h1, w2_ref[...], preferred_element_type=jnp.float32) + b2_ref[...]
    h2 = jnp.maximum(h2, 0.2 * h2)                              # LeakyReLU(0.2)

    # fc3 straight into the narrow (tb, 4) output block — no lane padding.
    o_ref[...] = (jnp.dot(h2, w3_ref[...], preferred_element_type=jnp.float32)
                  + b3_ref[...]).astype(o_ref.dtype)


def classifier_nn_forward(x, params, *, tb=2048):
    """x: (B, 2) f32. params: dict of w1,b1,w2,b2,w3,b3 with (in,out)/(1,out) shapes.

    tb: batch tile. ~3 KiB VMEM per row (x/out double-buffers + h1/h2 temporaries),
    so tb up to ~8192 fits the 32 MiB budget on every chip. Keep B/tb >= 2 for
    v7x TensorCore sharding on large batches.
    """
    B, F_in = x.shape
    w1, b1 = params["w1"], params["b1"]
    w2, b2 = params["w2"], params["b2"]
    w3, b3 = params["w3"], params["b3"]
    H1, H2, F_out = w1.shape[1], w2.shape[1], w3.shape[1]

    # Effective tile: never larger than the (8-rounded) batch; always a multiple of 8.
    tb_eff = max(8, min(_round_up(tb, 8), _round_up(B, 8)))
    num_tiles = pl.cdiv(B, tb_eff)
    B_pad = num_tiles * tb_eff

    # Pad the batch only if needed (common large-B path does no wrapper copies).
    x_p = jnp.pad(x, ((0, B_pad - B), (0, 0))) if B_pad != B else x

    out = pl.pallas_call(
        mlp_kernel,
        out_shape=jax.ShapeDtypeStruct((B_pad, F_out), jnp.float32),
        grid_spec=pltpu.PrefetchScalarGridSpec(
            num_scalar_prefetch=0,
            grid=(num_tiles,),
            in_specs=[
                pl.BlockSpec((tb_eff, F_in), lambda i: (i, 0)),   # x tile over batch
                pl.BlockSpec((F_in, H1),     lambda i: (0, 0)),   # w1 (resident)
                pl.BlockSpec((1, H1),        lambda i: (0, 0)),   # b1
                pl.BlockSpec((H1, H2),       lambda i: (0, 0)),   # w2
                pl.BlockSpec((1, H2),        lambda i: (0, 0)),   # b2
                pl.BlockSpec((H2, F_out),    lambda i: (0, 0)),   # w3 (unpadded, 64x4)
                pl.BlockSpec((1, F_out),     lambda i: (0, 0)),   # b3
            ],
            out_specs=pl.BlockSpec((tb_eff, F_out), lambda i: (i, 0)),
        ),
        compiler_params=pltpu.CompilerParams(
            dimension_semantics=("parallel",),
            vmem_limit_bytes=32 << 20),
    )(x_p, w1, b1, w2, b2, w3, b3)

    return out[:B] if B_pad != B else out


def init_params(key):
    """Deterministic PyTorch-style init: U(-1/sqrt(fan_in), 1/sqrt(fan_in))."""
    dims = [(2, 128), (128, 64), (64, 4)]
    params = {}
    for idx, (fan_in, fan_out) in enumerate(dims, start=1):
        key, kw, kb = jax.random.split(key, 3)
        bound = 1.0 / jnp.sqrt(float(fan_in))
        # PyTorch stores W as (out,in); we keep the transposed (in,out) layout directly.
        params[f"w{idx}"] = jax.random.uniform(
            kw, (fan_in, fan_out), jnp.float32, -bound, bound)
        params[f"b{idx}"] = jax.random.uniform(
            kb, (1, fan_out), jnp.float32, -bound, bound)
    return params


if __name__ == "__main__":
    key = jax.random.PRNGKey(0)
    key, kx = jax.random.split(key)
    params = init_params(key)

    # B=256 with tb=128: 2-step grid, divisible batch (no wrapper padding path).
    B = 256
    x = jax.random.normal(kx, (B, 2), dtype=jnp.float32)
    out = classifier_nn_forward(x, params, tb=128)
    jax.block_until_ready(out)

    # Also exercise the non-divisible batch tail (wrapper pad + slice path).
    x_tail = x[:200]
    out_tail = classifier_nn_forward(x_tail, params, tb=128)
    jax.block_until_ready(out_tail)

    # Reference check in plain JAX (same eval-mode semantics).
    def leaky(v):
        return jnp.maximum(v, 0.2 * v)

    def ref_fn(xx):
        r = leaky(xx @ params["w1"] + params["b1"])
        r = leaky(r @ params["w2"] + params["b2"])
        return r @ params["w3"] + params["b3"]

    assert out.shape == (B, 4)
    assert out_tail.shape == (200, 4)
    assert jnp.allclose(out, ref_fn(x), atol=1e-5, rtol=1e-5)
    assert jnp.allclose(out_tail, ref_fn(x_tail), atol=1e-5, rtol=1e-5)

    print("KERNEL_OK")
</pallas_src>

<mosaic_0001>
module attributes {stable_mosaic.version = 11 : i64} {
  func.func @mlp_kernel(%arg0: i32, %arg1: memref<128x2xf32, #tpu.memory_space<vmem>>, %arg2: memref<2x128xf32, #tpu.memory_space<vmem>>, %arg3: memref<1x128xf32, #tpu.memory_space<vmem>>, %arg4: memref<128x64xf32, #tpu.memory_space<vmem>>, %arg5: memref<1x64xf32, #tpu.memory_space<vmem>>, %arg6: memref<64x4xf32, #tpu.memory_space<vmem>>, %arg7: memref<1x4xf32, #tpu.memory_space<vmem>>, %arg8: memref<128x4xf32, #tpu.memory_space<vmem>>) attributes {dimension_semantics = [#tpu.dimension_semantics<parallel>], iteration_bounds = array<i64: 2>, scalar_prefetch = 0 : i64, scratch_operands = 0 : i64, tpu.core_type = #tpu.core_type<tc>, window_params = [{transform_indices = @transform_0, window_bounds = array<i64: 128, 2>}, {pipeline_mode = #tpu.pipeline_mode<synchronous>, transform_indices = @transform_1, window_bounds = array<i64: 2, 128>}, {pipeline_mode = #tpu.pipeline_mode<synchronous>, transform_indices = @transform_2, window_bounds = array<i64: 1, 128>}, {pipeline_mode = #tpu.pipeline_mode<synchronous>, transform_indices = @transform_3, window_bounds = array<i64: 128, 64>}, {pipeline_mode = #tpu.pipeline_mode<synchronous>, transform_indices = @transform_4, window_bounds = array<i64: 1, 64>}, {pipeline_mode = #tpu.pipeline_mode<synchronous>, transform_indices = @transform_5, window_bounds = array<i64: 64, 4>}, {pipeline_mode = #tpu.pipeline_mode<synchronous>, transform_indices = @transform_6, window_bounds = array<i64: 1, 4>}, {transform_indices = @transform_7, window_bounds = array<i64: 128, 4>}]} {
    %c0 = arith.constant 0 : index
    %c0_0 = arith.constant 0 : index
    %0 = vector.load %arg1[%c0, %c0_0] : memref<128x2xf32, #tpu.memory_space<vmem>>, vector<128x2xf32>
    %c0_1 = arith.constant 0 : index
    %c0_2 = arith.constant 0 : index
    %1 = vector.load %arg2[%c0_1, %c0_2] : memref<2x128xf32, #tpu.memory_space<vmem>>, vector<2x128xf32>
    %cst = arith.constant dense<0.000000e+00> : vector<128x128xf32>
    %2 = tpu.matmul %0, %1, %cst {dimension_numbers = #tpu.dot_dimension_numbers<[1], [0], [0], [1], [0, 0, 1, 1], [], []>} : vector<128x2xf32>, vector<2x128xf32>, vector<128x128xf32> -> vector<128x128xf32>
    %c0_3 = arith.constant 0 : index
    %c0_4 = arith.constant 0 : index
    %3 = vector.load %arg3[%c0_3, %c0_4] : memref<1x128xf32, #tpu.memory_space<vmem>>, vector<1x128xf32>
    %4 = vector.broadcast %3 : vector<1x128xf32> to vector<128x128xf32>
    %5 = arith.addf %2, %4 : vector<128x128xf32>
    %cst_5 = arith.constant 2.000000e-01 : f32
    %6 = vector.broadcast %cst_5 : f32 to vector<128x128xf32>
    %7 = arith.mulf %6, %5 : vector<128x128xf32>
    %8 = arith.maximumf %5, %7 : vector<128x128xf32>
    %c0_6 = arith.constant 0 : index
    %c0_7 = arith.constant 0 : index
    %9 = vector.load %arg4[%c0_6, %c0_7] : memref<128x64xf32, #tpu.memory_space<vmem>>, vector<128x64xf32>
    %cst_8 = arith.constant dense<0.000000e+00> : vector<128x64xf32>
    %10 = tpu.matmul %8, %9, %cst_8 {dimension_numbers = #tpu.dot_dimension_numbers<[1], [0], [0], [1], [0, 0, 1, 1], [], []>} : vector<128x128xf32>, vector<128x64xf32>, vector<128x64xf32> -> vector<128x64xf32>
    %c0_9 = arith.constant 0 : index
    %c0_10 = arith.constant 0 : index
    %11 = vector.load %arg5[%c0_9, %c0_10] : memref<1x64xf32, #tpu.memory_space<vmem>>, vector<1x64xf32>
    %12 = vector.broadcast %11 : vector<1x64xf32> to vector<128x64xf32>
    %13 = arith.addf %10, %12 : vector<128x64xf32>
    %cst_11 = arith.constant 2.000000e-01 : f32
    %14 = vector.broadcast %cst_11 : f32 to vector<128x64xf32>
    %15 = arith.mulf %14, %13 : vector<128x64xf32>
    %16 = arith.maximumf %13, %15 : vector<128x64xf32>
    %c0_12 = arith.constant 0 : index
    %c0_13 = arith.constant 0 : index
    %17 = vector.load %arg6[%c0_12, %c0_13] : memref<64x4xf32, #tpu.memory_space<vmem>>, vector<64x4xf32>
    %cst_14 = arith.constant dense<0.000000e+00> : vector<128x4xf32>
    %18 = tpu.matmul %16, %17, %cst_14 {dimension_numbers = #tpu.dot_dimension_numbers<[1], [0], [0], [1], [0, 0, 1, 1], [], []>} : vector<128x64xf32>, vector<64x4xf32>, vector<128x4xf32> -> vector<128x4xf32>
    %c0_15 = arith.constant 0 : index
    %c0_16 = arith.constant 0 : index
    %19 = vector.load %arg7[%c0_15, %c0_16] : memref<1x4xf32, #tpu.memory_space<vmem>>, vector<1x4xf32>
    %20 = vector.broadcast %19 : vector<1x4xf32> to vector<128x4xf32>
    %21 = arith.addf %18, %20 : vector<128x4xf32>
    %c0_17 = arith.constant 0 : index
    %c0_18 = arith.constant 0 : index
    %22 = vector.load %arg8[%c0_17, %c0_18] : memref<128x4xf32, #tpu.memory_space<vmem>>, vector<128x4xf32>
    tpu.vector_store %arg8[%c0_17, %c0_18], %21 {strides = array<i32>} : memref<128x4xf32, #tpu.memory_space<vmem>>, vector<128x4xf32>,
    return
  }
  func.func @transform_0(%arg0: i32) -> (i32, i32) {
    %c0_i32 = arith.constant 0 : i32
    %c0_i32_0 = arith.constant 0 : i32
    return %arg0, %c0_i32 : i32, i32
  }
  func.func @transform_1(%arg0: i32) -> (i32, i32) {
    %c0_i32 = arith.constant 0 : i32
    %c0_i32_0 = arith.constant 0 : i32
    %c0_i32_1 = arith.constant 0 : i32
    return %c0_i32, %c0_i32_0 : i32, i32
  }
  func.func @transform_2(%arg0: i32) -> (i32, i32) {
    %c0_i32 = arith.constant 0 : i32
    %c0_i32_0 = arith.constant 0 : i32
    %c0_i32_1 = arith.constant 0 : i32
    return %c0_i32, %c0_i32_0 : i32, i32
  }
  func.func @transform_3(%arg0: i32) -> (i32, i32) {
    %c0_i32 = arith.constant 0 : i32
    %c0_i32_0 = arith.constant 0 : i32
    %c0_i32_1 = arith.constant 0 : i32
    return %c0_i32, %c0_i32_0 : i32, i32
  }
  func.func @transform_4(%arg0: i32) -> (i32, i32) {
    %c0_i32 = arith.constant 0 : i32
    %c0_i32_0 = arith.constant 0 : i32
    %c0_i32_1 = arith.constant 0 : i32
    return %c0_i32, %c0_i32_0 : i32, i32
  }
  func.func @transform_5(%arg0: i32) -> (i32, i32) {
    %c0_i32 = arith.constant 0 : i32
    %c0_i32_0 = arith.constant 0 : i32
    %c0_i32_1 = arith.constant 0 : i32
    return %c0_i32, %c0_i32_0 : i32, i32
  }
  func.func @transform_6(%arg0: i32) -> (i32, i32) {
    %c0_i32 = arith.constant 0 : i32
    %c0_i32_0 = arith.constant 0 : i32
    %c0_i32_1 = arith.constant 0 : i32
    return %c0_i32, %c0_i32_0 : i32, i32
  }
  func.func @transform_7(%arg0: i32) -> (i32, i32) {
    %c0_i32 = arith.constant 0 : i32
    %c0_i32_0 = arith.constant 0 : i32
    return %arg0, %c0_i32 : i32, i32
  }
}

</mosaic_0001>

<bundles_post_ra>
// kernel: tpu_custom_call.1
= control target key start
LH: loop header
LB: loop body
LE: loop exit
PB: predicated region body
PF: predicated region fallthrough
CT: control target
= control target key end

     0   :  { %s1364_s24 = smov 0   ;;  %s1592_s0 = inlined_call_operand.vmem [shape: f32[256,2], index: 0, kind: input, shape index: {}]   ;;  %s1593_s1 = inlined_call_operand.vmem [shape: f32[2,128], index: 1, kind: input, shape index: {}]   ;;  %s1594_s2 = inlined_call_operand.vmem [shape: f32[1,128], index: 2, kind: input, shape index: {}]   ;;  %s1595_s3 = inlined_call_operand.vmem [shape: f32[128,64], index: 3, kind: input, shape index: {}]   ;;  %s1596_s4 = inlined_call_operand.vmem [shape: f32[1,64], index: 4, kind: input, shape index: {}]   ;;  %s1597_s5 = inlined_call_operand.vmem [shape: f32[64,4], index: 5, kind: input, shape index: {}]   ;;  %s1598_s6 = inlined_call_operand.vmem [shape: f32[1,4], index: 6, kind: input, shape index: {}]   ;;  %s1599_s7 = inlined_call_operand.vmem [shape: f32[256,4], index: 7, kind: output, shape index: {}]  }
   0x1 LB: > { %s1018_s25 = sadd.s32 4294967295, %s1322_s24   ;;  %p1022_p0 = scmp.ge.s32.totalorder %s1322_s24, 1  ;;  %s1322_s24 = sphi %s1364_s24, %s17_s24  }
   0x2   : > { %p238_p1 = scmp.lt.s32.totalorder %s1322_s24, 3 }
   0x4   : > { %p239_p2 = pnand %p1022_p0, %p238_p1 }
   0x5   : > { %v298_v0 = vld [vmem:[%s1593_s1] sm:$0x3] (!%p239_p2)  ;;  %vm355_vm0 = vcmask (!%p239_p2), 1041408   ;;  %s1023_s28 = sshll.u32 (!%p239_p2), %s1018_s25, 4  ;;  %v537_v2 = vld [vmem:[%s1595_s3 + $0x8] sm:$0xff] (!%p239_p2)  ;;  %v538_v3 = vld [vmem:[%s1595_s3 + $0x10] sm:$0xff] (!%p239_p2) }
   0x6   : > { %242 = sbr.rel (%p239_p2) target bundleno = 702 (0x2be), region = 48  ;;  %v536_v1 = vld [vmem:[%s1595_s3] sm:$0xff] (!%p239_p2)  ;;  %1138 = vmatprep.subr.msk.mxu0 (!%p239_p2), %vm355_vm0, %v298_v0  ;;  %p271_p3 = scmp.lt.s32.totalorder (!%p239_p2), %s1023_s28, 31  ;;  %v539_v4 = vld [vmem:[%s1595_s3 + $0x18] sm:$0xff] (!%p239_p2)  ;;  %v541_v8 = vld [vmem:[%s1595_s3 + $0x28] sm:$0xff] (!%p239_p2)  ;;  %vm306_vm1 = vcmask (!%p239_p2), 15360  }
   0x7   : > { %1139 = vmatpush3.msk.msra.mxu0 (!%p239_p2), %vm355_vm0, %v298_v0  ;;  %v1260_v5 = vpack.c.bf16 (!%p239_p2), %v537_v2, %v536_v1  ;;  %v1264_v6 = vpack.c.bf16 (!%p239_p2), %v539_v4, %v538_v3  ;;  %v540_v7 = vld [vmem:[%s1595_s3 + $0x20] sm:$0xff] (!%p239_p2)  ;;  %v542_v10 = vld [vmem:[%s1595_s3 + $0x30] sm:$0xff] (!%p239_p2)  ;;  %v543_v11 = vld [vmem:[%s1595_s3 + $0x38] sm:$0xff] (!%p239_p2)  ;;  %vm751_vm2 = vcmask (!%p239_p2), 523264   ;;  %vm945_vm3 = vcmask (!%p239_p2), 31744  }
   0x8   : > { %v1268_v9 = vpack.c.bf16 (!%p239_p2), %v541_v8, %v540_v7  ;;  %v1272_v16 = vpack.c.bf16 (!%p239_p2), %v543_v11, %v542_v10  ;;  %v544_v18 = vld [vmem:[%s1595_s3 + $0x40] sm:$0xff] (!%p239_p2)  ;;  %v545_v19 = vld [vmem:[%s1595_s3 + $0x48] sm:$0xff] (!%p239_p2)  ;;  %v546_v23 = vld [vmem:[%s1595_s3 + $0x50] sm:$0xff] (!%p239_p2) }
   0x9   : > { %1261 = vmatprep.subr.bf16.mxu1 (!%p239_p2), %v1260_v5  ;;  %v1276_v21 = vpack.c.bf16 (!%p239_p2), %v545_v19, %v544_v18  ;;  %v547_v24 = vld [vmem:[%s1595_s3 + $0x58] sm:$0xff] (!%p239_p2)  ;;  %v548_v35 = vld [vmem:[%s1595_s3 + $0x60] sm:$0xff] (!%p239_p2)  ;;  %v549_v36 = vld [vmem:[%s1595_s3 + $0x68] sm:$0xff] (!%p239_p2) }
   0xa   : > { %1263 = vmatpush3.bf16.msra.mxu1 (!%p239_p2), %v1260_v5  ;;  %v1280_v26 = vpack.c.bf16 (!%p239_p2), %v547_v24, %v546_v23  ;;  %v1284_v37 = vpack.c.bf16 (!%p239_p2), %v549_v36, %v548_v35  ;;  %v550_v38 = vld [vmem:[%s1595_s3 + $0x70] sm:$0xff] (!%p239_p2)  ;;  %v551_v39 = vld [vmem:[%s1595_s3 + $0x78] sm:$0xff] (!%p239_p2)  ;;  %v736_v41 = vld [vmem:[%s1597_s5] sm:$0xff] (!%p239_p2) }
   0xb   : > { %1265 = vmatprep.subr.bf16.mxu1 (!%p239_p2), %v1264_v6  ;;  %v1288_v40 = vpack.c.bf16 (!%p239_p2), %v551_v39, %v550_v38  ;;  %v737_v42 = vld [vmem:[%s1597_s5 + $0x8] sm:$0xff] (!%p239_p2)  ;;  %v738_v43 = vld [vmem:[%s1597_s5 + $0x10] sm:$0xff] (!%p239_p2)  ;;  %v739_v45 = vld [vmem:[%s1597_s5 + $0x18] sm:$0xff] (!%p239_p2) }
   0xc   : > { %v1292_v44 = vpack.c.bf16 (!%p239_p2), %v737_v42, %v736_v41  ;;  %v1296_v46 = vpack.c.bf16 (!%p239_p2), %v739_v45, %v738_v43  ;;  %v740_v47 = vld [vmem:[%s1597_s5 + $0x20] sm:$0xff] (!%p239_p2)  ;;  %v741_v48 = vld [vmem:[%s1597_s5 + $0x28] sm:$0xff] (!%p239_p2) }
   0xd   : > { %s1601_s28 = smov (!%p271_p3, %s1023_s28), 31  ;;  %v1300_v49 = vpack.c.bf16 %v741_v48, %v740_v47  ;;  %v1486_v50 = vld [vmem:[%s1594_s2] ss:$0 sm:$0xff] }
   0xe   : > { %s1024_s18 = sshll.u32 %s1601_s28, 3  ;;  %1267 = vmatpush3.bf16.msra.mxu1 %v1264_v6  ;;  %1293 = vmatprep.subr.bf16.mxu0 %v1292_v44 }
   0xf   : > { %s1401_s21 = scalar_lea.vmem %s1592_s0, %s1024_s18  ;;  %1269 = vmatprep.subr.bf16.mxu1 %v1268_v9  ;;  %s1555_s27 = scalar_lea.vmem %s1599_s7, %s1024_s18 }
  0x10   : > { %v282_v12 = vld [vmem:[%s1401_s21] sm:$0xff]  ;;  %v283_v13 = vld [vmem:[%s1401_s21 + $0x8] sm:$0xff]  ;;  %v284_v14 = vld [vmem:[%s1401_s21 + $0x10] sm:$0xff] }
  0x11   : > { %1140 = vmatprep.mubr.msk.f32.mxu0 %vm306_vm1, %v282_v12  ;;  %v285_v15 = vld [vmem:[%s1401_s21 + $0x18] sm:$0xff]  ;;  %v286_v17 = vld [vmem:[%s1401_s21 + $0x20] sm:$0xff]  ;;  %v287_v20 = vld [vmem:[%s1401_s21 + $0x28] sm:$0xff] }
  0x12   : > { %1141 = vmatmul.mubr.msk.f32.vlgmr.msra.gmra.mrb[0].mxu0 %vm306_vm1, %v283_v13  ;;  %1271 = vmatpush3.bf16.msra.mxu1 %v1268_v9  ;;  %v288_v22 = vld [vmem:[%s1401_s21 + $0x30] sm:$0xff]  ;;  %v289_v25 = vld [vmem:[%s1401_s21 + $0x38] sm:$0xff]  ;;  %v290_v27 = vld [vmem:[%s1401_s21 + $0x40] sm:$0xff] }
  0x13   : > { %1143 = vmatprep.mubr.msk.f32.mxu0 %vm306_vm1, %v284_v14  ;;  %1273 = vmatprep.subr.bf16.mxu1 %v1272_v16  ;;  %v291_v28 = vld [vmem:[%s1401_s21 + $0x48] sm:$0xff]  ;;  %v292_v29 = vld [vmem:[%s1401_s21 + $0x50] sm:$0xff]  ;;  %v293_v30 = vld [vmem:[%s1401_s21 + $0x58] sm:$0xff] }
  0x14   : > { %v294_v31 = vld [vmem:[%s1401_s21 + $0x60] sm:$0xff]  ;;  %v295_v32 = vld [vmem:[%s1401_s21 + $0x68] sm:$0xff]  ;;  %v296_v33 = vld [vmem:[%s1401_s21 + $0x70] sm:$0xff]  ;;  %1295 = vmatpush3.bf16.msra.mxu0 %v1292_v44 }
  0x15   : > { %v297_v34 = vld [vmem:[%s1401_s21 + $0x78] sm:$0xff]  ;;  %1297 = vmatprep.subr.bf16.mxu0 %v1296_v46 }
  0x16   : > { %1144 = vmatmul.mubr.msk.f32.gmra.mrb[2].mxu0 %vm306_vm1, %v285_v15  ;;  %1275 = vmatpush3.bf16.msra.mxu1 %v1272_v16 }
  0x17   : > { %1146 = vmatprep.mubr.msk.f32.mxu0 %vm306_vm1, %v286_v17  ;;  %1277 = vmatprep.subr.bf16.mxu1 %v1276_v21 }
  0x18   : > { %1299 = vmatpush3.bf16.msra.mxu0 %v1296_v46 }
  0x19   : > { %1301 = vmatprep.subr.bf16.mxu0 %v1300_v49 }
  0x1a   : > { %1147 = vmatmul.mubr.msk.f32.gmra.mrb[4].mxu0 %vm306_vm1, %v287_v20  ;;  %1279 = vmatpush3.bf16.msra.mxu1 %v1276_v21 }
  0x1b   : > { %1149 = vmatprep.mubr.msk.f32.mxu0 %vm306_vm1, %v288_v22  ;;  %1281 = vmatprep.subr.bf16.mxu1 %v1280_v26 }
  0x1c   : > { %1303 = vmatpush3.bf16.msra.mxu0 %v1300_v49 }
  0x1e   : > { %1150 = vmatmul.mubr.msk.f32.gmra.mrb[6].mxu0 %vm306_vm1, %v289_v25  ;;  %1283 = vmatpush3.bf16.msra.mxu1 %v1280_v26 }
  0x1f   : > { %1152 = vmatprep.mubr.msk.f32.mxu0 %vm306_vm1, %v290_v27  ;;  %1285 = vmatprep.subr.bf16.mxu1 %v1284_v37 }
  0x22   : > { %1153 = vmatmul.mubr.msk.f32.gmra.mrb[8].mxu0 %vm306_vm1, %v291_v28  ;;  %1287 = vmatpush3.bf16.msra.mxu1 %v1284_v37 }
  0x23   : > { %1155 = vmatprep.mubr.msk.f32.mxu0 %vm306_vm1, %v292_v29  ;;  %1289 = vmatprep.subr.bf16.mxu1 %v1288_v40 }
  0x26   : > { %1156 = vmatmul.mubr.msk.f32.gmra.mrb[10].mxu0 %vm306_vm1, %v293_v30  ;;  %1291 = vmatpush3.bf16.msra.mxu1 %v1288_v40 }
  0x27   : > { %1158 = vmatprep.mubr.msk.f32.mxu0 %vm306_vm1, %v294_v31 }
  0x2a   : > { %1159 = vmatmul.mubr.msk.f32.gmra.mrb[12].mxu0 %vm306_vm1, %v295_v32 }
  0x2b   : > { %1161 = vmatprep.mubr.msk.f32.mxu0 %vm306_vm1, %v296_v33 }
  0x2e   : > { %1162 = vmatmul.mubr.msk.f32.gmra.mrb[14].mxu0 %vm306_vm1, %v297_v34 }
  0xe5   : > { %v1142_v51 = vpop.f32.mrb[0].mxu0 }
  0xe6   : > { %v431_v52 = vadd.f32 %v1142_v51, %v1486_v50  ;;  %v425_v53 = vpop.f32.mrb[1].mxu0 }
  0xe7   : > { %v426_v54 = vadd.f32 %v1486_v50, %v425_v53  ;;  %v743_v53 = vld [vmem:[%s1597_s5 + $0x38] sm:$0xff] }
  0xe8   : > { %v505_v55 = vmul.f32 0.2, %v431_v52 }
  0xe9   : > { %v1145_v56 = vpop.f32.mrb[2].mxu0  ;;  %v504_v57 = vmul.f32 0.2, %v426_v54 }
  0xea   : > { %v441_v58 = vadd.f32 %v1145_v56, %v1486_v50  ;;  %v435_v59 = vpop.f32.mrb[3].mxu0  ;;  %v521_v62 = vmax.f32 %v431_v52, %v505_v55  ;;  %v742_v52 = vld [vmem:[%s1597_s5 + $0x30] sm:$0xff] }
  0xeb   : > { %v436_v60 = vadd.f32 %v1486_v50, %v435_v59  ;;  %v520_v61 = vmax.f32 %v426_v54, %v504_v57  ;;  %v1304_v54 = vpack.c.bf16 %v743_v53, %v742_v52 }
  0xec   : > { %v507_v63 = vmul.f32 0.2, %v441_v58 }
  0xed   : > { %v506_v0 = vmul.f32 0.2, %v436_v60  ;;  %v1148_v1 = vpop.f32.mrb[4].mxu0  ;;  %1196 = vmatprep.mubr.f32.mxu1 %v520_v61  ;;  %1305 = vmatprep.subr.bf16.mxu0 %v1304_v54 }
  0xee   : > { %v451_v2 = vadd.f32 %v1148_v1, %v1486_v50  ;;  %v445_v3 = vpop.f32.mrb[5].mxu0  ;;  %1197 = vmatmul.mubr.f32.vlgmr.msra.gmra.mrb[0].mxu1 %v521_v62  ;;  %v523_v6 = vmax.f32 %v441_v58, %v507_v63  ;;  %1307 = vmatpush3.bf16.msra.mxu0 %v1304_v54 }
  0xef   : > { %v522_v4 = vmax.f32 %v436_v60, %v506_v0  ;;  %v446_v5 = vadd.f32 %v1486_v50, %v445_v3 }
  0xf0   : > { %v509_v7 = vmul.f32 0.2, %v451_v2 }
  0xf1   : > { %v508_v8 = vmul.f32 0.2, %v446_v5  ;;  %v1151_v9 = vpop.f32.mrb[6].mxu0  ;;  %1199 = vmatprep.mubr.f32.mxu1 %v522_v4 }
  0xf2   : > { %v461_v10 = vadd.f32 %v1151_v9, %v1486_v50  ;;  %v455_v11 = vpop.f32.mrb[7].mxu0  ;;  %1200 = vmatmul.mubr.f32.gmra.mrb[2].mxu1 %v523_v6  ;;  %v525_v14 = vmax.f32 %v451_v2, %v509_v7 }
  0xf3   : > { %v524_v12 = vmax.f32 %v446_v5, %v508_v8  ;;  %v456_v13 = vadd.f32 %v1486_v50, %v455_v11 }
  0xf4   : > { %v511_v15 = vmul.f32 0.2, %v461_v10 }
  0xf5   : > { %v510_v16 = vmul.f32 0.2, %v456_v13  ;;  %v1154_v17 = vpop.f32.mrb[8].mxu0  ;;  %1202 = vmatprep.mubr.f32.mxu1 %v524_v12 }
  0xf6   : > { %v471_v18 = vadd.f32 %v1154_v17, %v1486_v50  ;;  %v465_v19 = vpop.f32.mrb[9].mxu0  ;;  %1203 = vmatmul.mubr.f32.gmra.mrb[4].mxu1 %v525_v14  ;;  %v527_v22 = vmax.f32 %v461_v10, %v511_v15 }
  0xf7   : > { %v526_v20 = vmax.f32 %v456_v13, %v510_v16  ;;  %v466_v21 = vadd.f32 %v1486_v50, %v465_v19 }
  0xf8   : > { %v513_v23 = vmul.f32 0.2, %v471_v18 }
  0xf9   : > { %v512_v24 = vmul.f32 0.2, %v466_v21  ;;  %v1157_v25 = vpop.f32.mrb[10].mxu0  ;;  %1205 = vmatprep.mubr.f32.mxu1 %v526_v20 }
  0xfa   : > { %v481_v26 = vadd.f32 %v1157_v25, %v1486_v50  ;;  %v475_v27 = vpop.f32.mrb[11].mxu0  ;;  %1206 = vmatmul.mubr.f32.gmra.mrb[6].mxu1 %v527_v22  ;;  %v529_v30 = vmax.f32 %v471_v18, %v513_v23 }
  0xfb   : > { %v528_v28 = vmax.f32 %v466_v21, %v512_v24  ;;  %v476_v29 = vadd.f32 %v1486_v50, %v475_v27 }
  0xfc   : > { %v515_v31 = vmul.f32 0.2, %v481_v26 }
  0xfd   : > { %v514_v32 = vmul.f32 0.2, %v476_v29  ;;  %v1160_v33 = vpop.f32.mrb[12].mxu0  ;;  %1208 = vmatprep.mubr.f32.mxu1 %v528_v28 }
  0xfe   : > { %v491_v34 = vadd.f32 %v1160_v33, %v1486_v50  ;;  %v485_v35 = vpop.f32.mrb[13].mxu0  ;;  %1209 = vmatmul.mubr.f32.gmra.mrb[8].mxu1 %v529_v30  ;;  %v531_v38 = vmax.f32 %v481_v26, %v515_v31 }
  0xff   : > { %v530_v36 = vmax.f32 %v476_v29, %v514_v32  ;;  %v486_v37 = vadd.f32 %v1486_v50, %v485_v35 }
 0x100   : > { %v517_v39 = vmul.f32 0.2, %v491_v34 }
 0x101   : > { %v516_v40 = vmul.f32 0.2, %v486_v37  ;;  %v1163_v41 = vpop.f32.mrb[14].mxu0  ;;  %1211 = vmatprep.mubr.f32.mxu1 %v530_v36 }
 0x102   : > { %v501_v42 = vadd.f32 %v1163_v41, %v1486_v50  ;;  %v495_v43 = vpop.f32.mrb[15].mxu0  ;;  %1212 = vmatmul.mubr.f32.gmra.mrb[10].mxu1 %v531_v38  ;;  %v533_v46 = vmax.f32 %v491_v34, %v517_v39 }
 0x103   : > { %v532_v44 = vmax.f32 %v486_v37, %v516_v40  ;;  %v496_v45 = vadd.f32 %v1486_v50, %v495_v43  ;;  %v1513_v50 = vld [vmem:[%s1596_s4] ss:$0 sm:$0xff] }
 0x104   : > { %v519_v47 = vmul.f32 0.2, %v501_v42 }
 0x105   : > { %v518_v48 = vmul.f32 0.2, %v496_v45  ;;  %1214 = vmatprep.mubr.f32.mxu1 %v532_v44 }
 0x106   : > { %1215 = vmatmul.mubr.f32.gmra.mrb[12].mxu1 %v533_v46  ;;  %v535_v51 = vmax.f32 %v501_v42, %v519_v47 }
 0x107   : > { %v534_v49 = vmax.f32 %v496_v45, %v518_v48 }
 0x109   : > { %1217 = vmatprep.mubr.f32.mxu1 %v534_v49 }
 0x10a   : > { %1218 = vmatmul.mubr.f32.gmra.mrb[14].mxu1 %v535_v51 }
 0x1c1   : > { %v1198_v55 = vpop.f32.mrb[0].mxu1 }
 0x1c2   : > { %v631_v56 = vadd.f32 %v1198_v55, %v1513_v50  ;;  %v625_v57 = vpop.f32.mrb[1].mxu1 }
 0x1c3   : > { %v626_v58 = vadd.f32 %v1513_v50, %v625_v57 }
 0x1c4   : > { %v705_v59 = vmul.f32 0.2, %v631_v56 }
 0x1c5   : > { %v704_v60 = vmul.f32 0.2, %v626_v58  ;;  %v1201_v61 = vpop.f32.mrb[2].mxu1 }
 0x1c6   : > { %v641_v62 = vadd.f32 %v1201_v61, %v1513_v50  ;;  %v635_v63 = vpop.f32.mrb[3].mxu1  ;;  %v721_v2 = vmax.f32 %v631_v56, %v705_v59  ;;  %v1046_v56 = vld [vmem:[%s1598_s6] ss:$0 sm:$0xff] }
 0x1c7   : > { %v720_v0 = vmax.f32 %v626_v58, %v704_v60  ;;  %v636_v1 = vadd.f32 %v1513_v50, %v635_v63 }
 0x1c8   : > { %v707_v3 = vmul.f32 0.2, %v641_v62 }
 0x1c9   : > { %v706_v4 = vmul.f32 0.2, %v636_v1  ;;  %v1204_v5 = vpop.f32.mrb[4].mxu1  ;;  %1236 = vmatprep.mubr.msk.f32.mxu0 %vm751_vm2, %v720_v0 }
 0x1ca   : > { %v651_v6 = vadd.f32 %v1204_v5, %v1513_v50  ;;  %v645_v7 = vpop.f32.mrb[5].mxu1  ;;  %1237 = vmatmul.mubr.msk.f32.vlgmr.msra.gmra.mrb[16].mxu0 %vm751_vm2, %v721_v2  ;;  %v723_v10 = vmax.f32 %v641_v62, %v707_v3 }
 0x1cb   : > { %v722_v8 = vmax.f32 %v636_v1, %v706_v4  ;;  %v646_v9 = vadd.f32 %v1513_v50, %v645_v7 }
 0x1cc   : > { %v709_v11 = vmul.f32 0.2, %v651_v6 }
 0x1cd   : > { %v708_v12 = vmul.f32 0.2, %v646_v9  ;;  %v1207_v13 = vpop.f32.mrb[6].mxu1  ;;  %1239 = vmatprep.mubr.msk.f32.mxu0 %vm751_vm2, %v722_v8 }
 0x1ce   : > { %v661_v14 = vadd.f32 %v1207_v13, %v1513_v50  ;;  %v655_v15 = vpop.f32.mrb[7].mxu1  ;;  %1240 = vmatmul.mubr.msk.f32.gmra.mrb[18].mxu0 %vm751_vm2, %v723_v10  ;;  %v725_v18 = vmax.f32 %v651_v6, %v709_v11 }
 0x1cf   : > { %v724_v16 = vmax.f32 %v646_v9, %v708_v12  ;;  %v656_v17 = vadd.f32 %v1513_v50, %v655_v15 }
 0x1d0   : > { %v711_v19 = vmul.f32 0.2, %v661_v14 }
 0x1d1   : > { %v710_v20 = vmul.f32 0.2, %v656_v17  ;;  %v1210_v21 = vpop.f32.mrb[8].mxu1  ;;  %1242 = vmatprep.mubr.msk.f32.mxu0 %vm751_vm2, %v724_v16 }
 0x1d2   : > { %v671_v22 = vadd.f32 %v1210_v21, %v1513_v50  ;;  %v665_v23 = vpop.f32.mrb[9].mxu1  ;;  %1243 = vmatmul.mubr.msk.f32.gmra.mrb[20].mxu0 %vm751_vm2, %v725_v18  ;;  %v727_v26 = vmax.f32 %v661_v14, %v711_v19 }
 0x1d3   : > { %v726_v24 = vmax.f32 %v656_v17, %v710_v20  ;;  %v666_v25 = vadd.f32 %v1513_v50, %v665_v23 }
 0x1d4   : > { %v713_v27 = vmul.f32 0.2, %v671_v22 }
 0x1d5   : > { %v712_v28 = vmul.f32 0.2, %v666_v25  ;;  %v1213_v29 = vpop.f32.mrb[10].mxu1  ;;  %1245 = vmatprep.mubr.msk.f32.mxu0 %vm751_vm2, %v726_v24 }
 0x1d6   : > { %v681_v30 = vadd.f32 %v1213_v29, %v1513_v50  ;;  %v675_v31 = vpop.f32.mrb[11].mxu1  ;;  %1246 = vmatmul.mubr.msk.f32.gmra.mrb[22].mxu0 %vm751_vm2, %v727_v26  ;;  %v729_v34 = vmax.f32 %v671_v22, %v713_v27 }
 0x1d7   : > { %v728_v32 = vmax.f32 %v666_v25, %v712_v28  ;;  %v676_v33 = vadd.f32 %v1513_v50, %v675_v31 }
 0x1d8   : > { %v715_v35 = vmul.f32 0.2, %v681_v30 }
 0x1d9   : > { %v714_v36 = vmul.f32 0.2, %v676_v33  ;;  %v1216_v37 = vpop.f32.mrb[12].mxu1  ;;  %1248 = vmatprep.mubr.msk.f32.mxu0 %vm751_vm2, %v728_v32 }
 0x1da   : > { %v691_v38 = vadd.f32 %v1216_v37, %v1513_v50  ;;  %v685_v39 = vpop.f32.mrb[13].mxu1  ;;  %1249 = vmatmul.mubr.msk.f32.gmra.mrb[24].mxu0 %vm751_vm2, %v729_v34  ;;  %v731_v42 = vmax.f32 %v681_v30, %v715_v35 }
 0x1db   : > { %v730_v40 = vmax.f32 %v676_v33, %v714_v36  ;;  %v686_v41 = vadd.f32 %v1513_v50, %v685_v39 }
 0x1dc   : > { %v717_v43 = vmul.f32 0.2, %v691_v38 }
 0x1dd   : > { %v716_v44 = vmul.f32 0.2, %v686_v41  ;;  %v1219_v45 = vpop.f32.mrb[14].mxu1  ;;  %1251 = vmatprep.mubr.msk.f32.mxu0 %vm751_vm2, %v730_v40 }
 0x1de   : > { %v701_v46 = vadd.f32 %v1219_v45, %v1513_v50  ;;  %v695_v47 = vpop.f32.mrb[15].mxu1  ;;  %1252 = vmatmul.mubr.msk.f32.gmra.mrb[26].mxu0 %vm751_vm2, %v731_v42  ;;  %v733_v51 = vmax.f32 %v691_v38, %v717_v43 }
 0x1df   : > { %v732_v48 = vmax.f32 %v686_v41, %v716_v44  ;;  %v696_v49 = vadd.f32 %v1513_v50, %v695_v47 }
 0x1e0   : > { %v719_v52 = vmul.f32 0.2, %v701_v46 }
 0x1e1   : > { %v718_v53 = vmul.f32 0.2, %v696_v49  ;;  %1254 = vmatprep.mubr.msk.f32.mxu0 %vm751_vm2, %v732_v48 }
 0x1e2   : > { %1255 = vmatmul.mubr.msk.f32.gmra.mrb[28].mxu0 %vm751_vm2, %v733_v51  ;;  %v735_v55 = vmax.f32 %v701_v46, %v719_v52 }
 0x1e3   : > { %v734_v54 = vmax.f32 %v696_v49, %v718_v53 }
 0x1e5   : > { %1257 = vmatprep.mubr.msk.f32.mxu0 %vm751_vm2, %v734_v54 }
 0x1e6   : > { %1258 = vmatmul.mubr.msk.f32.gmra.mrb[30].mxu0 %vm751_vm2, %v735_v55 }
 0x29d   : > { %v1238_v50 = vpop.f32.mrb[16].mxu0 }
 0x29e   : > { %v872_v57 = vadd.f32 %v1238_v50, %v1046_v56  ;;  %v866_v58 = vpop.f32.mrb[17].mxu0 }
 0x29f   : > { %v867_v59 = vadd.f32 %v1046_v56, %v866_v58 }
 0x2a0   : > { %947 = vst.msk [vmem:[%s1555_s27 + $0x8] sm:$0xff] %vm945_vm3, %v872_v57 }
 0x2a1   : > { %946 = vst.msk [vmem:[%s1555_s27] sm:$0xff] %vm945_vm3, %v867_v59  ;;  %v1241_v60 = vpop.f32.mrb[18].mxu0 }
 0x2a2   : > { %v882_v61 = vadd.f32 %v1241_v60, %v1046_v56  ;;  %v876_v62 = vpop.f32.mrb[19].mxu0 }
 0x2a3   : > { %v877_v63 = vadd.f32 %v1046_v56, %v876_v62 }
 0x2a4   : > { %949 = vst.msk [vmem:[%s1555_s27 + $0x18] sm:$0xff] %vm945_vm3, %v882_v61 }
 0x2a5   : > { %948 = vst.msk [vmem:[%s1555_s27 + $0x10] sm:$0xff] %vm945_vm3, %v877_v63  ;;  %v1244_v0 = vpop.f32.mrb[20].mxu0 }
 0x2a6   : > { %v892_v1 = vadd.f32 %v1244_v0, %v1046_v56  ;;  %v886_v2 = vpop.f32.mrb[21].mxu0 }
 0x2a7   : > { %v887_v3 = vadd.f32 %v1046_v56, %v886_v2 }
 0x2a8   : > { %951 = vst.msk [vmem:[%s1555_s27 + $0x28] sm:$0xff] %vm945_vm3, %v892_v1 }
 0x2a9   : > { %950 = vst.msk [vmem:[%s1555_s27 + $0x20] sm:$0xff] %vm945_vm3, %v887_v3  ;;  %v1247_v4 = vpop.f32.mrb[22].mxu0 }
 0x2aa   : > { %v902_v5 = vadd.f32 %v1247_v4, %v1046_v56  ;;  %v896_v6 = vpop.f32.mrb[23].mxu0 }
 0x2ab   : > { %v897_v7 = vadd.f32 %v1046_v56, %v896_v6 }
 0x2ac   : > { %953 = vst.msk [vmem:[%s1555_s27 + $0x38] sm:$0xff] %vm945_vm3, %v902_v5 }
 0x2ad   : > { %952 = vst.msk [vmem:[%s1555_s27 + $0x30] sm:$0xff] %vm945_vm3, %v897_v7  ;;  %v1250_v8 = vpop.f32.mrb[24].mxu0 }
 0x2ae   : > { %v912_v9 = vadd.f32 %v1250_v8, %v1046_v56  ;;  %v906_v10 = vpop.f32.mrb[25].mxu0 }
 0x2af   : > { %v907_v11 = vadd.f32 %v1046_v56, %v906_v10 }
 0x2b0   : > { %955 = vst.msk [vmem:[%s1555_s27 + $0x48] sm:$0xff] %vm945_vm3, %v912_v9 }
 0x2b1   : > { %954 = vst.msk [vmem:[%s1555_s27 + $0x40] sm:$0xff] %vm945_vm3, %v907_v11  ;;  %v1253_v12 = vpop.f32.mrb[26].mxu0 }
 0x2b2   : > { %v922_v13 = vadd.f32 %v1253_v12, %v1046_v56  ;;  %v916_v14 = vpop.f32.mrb[27].mxu0 }
 0x2b3   : > { %v917_v15 = vadd.f32 %v1046_v56, %v916_v14 }
 0x2b4   : > { %957 = vst.msk [vmem:[%s1555_s27 + $0x58] sm:$0xff] %vm945_vm3, %v922_v13 }
 0x2b5   : > { %956 = vst.msk [vmem:[%s1555_s27 + $0x50] sm:$0xff] %vm945_vm3, %v917_v15  ;;  %v1256_v16 = vpop.f32.mrb[28].mxu0 }
 0x2b6   : > { %v932_v17 = vadd.f32 %v1256_v16, %v1046_v56  ;;  %v926_v18 = vpop.f32.mrb[29].mxu0 }
 0x2b7   : > { %v927_v19 = vadd.f32 %v1046_v56, %v926_v18 }
 0x2b8   : > { %959 = vst.msk [vmem:[%s1555_s27 + $0x68] sm:$0xff] %vm945_vm3, %v932_v17 }
 0x2b9   : > { %958 = vst.msk [vmem:[%s1555_s27 + $0x60] sm:$0xff] %vm945_vm3, %v927_v19  ;;  %v1259_v20 = vpop.f32.mrb[30].mxu0 }
 0x2ba   : > { %v942_v21 = vadd.f32 %v1259_v20, %v1046_v56  ;;  %v936_v22 = vpop.f32.mrb[31].mxu0 }
 0x2bb   : > { %v937_v23 = vadd.f32 %v1046_v56, %v936_v22 }
 0x2bc   : > { %961 = vst.msk [vmem:[%s1555_s27 + $0x78] sm:$0xff] %vm945_vm3, %v942_v21 }
 0x2bd   : > { %960 = vst.msk [vmem:[%s1555_s27 + $0x70] sm:$0xff] %vm945_vm3, %v937_v23 }
 0x2be PF: > { %s17_s24 = sadd.s32 1, %s1322_s24  }
 0x2bf   : > { %p14_p4 = scmp.ge.s32.totalorder %s17_s24, 4  }
 0x2c1   :  { %16 = sbr.rel (!%p14_p4) target bundleno = 1 (0x1), region = 78 }

</bundles_post_ra>
